<compile_context>
chip_gen: v6e
topology: v6e:2x2x1
jax: 0.10.0
libtpu: 0.0.40
codegen_flags: <defaults>
</compile_context>

<pallas_src>
import jax
import jax.numpy as jnp
from jax.experimental import pallas as pl
from jax.experimental.pallas import tpu as pltpu


# ----------------------------------------------------------------------------
# fused kernel: y = x @ W + b   (W already stored as (in, out) == PyTorch W.T)
# ----------------------------------------------------------------------------
def dense_kernel(x_ref, w_ref, b_ref, o_ref):
    o_ref[...] = (
        jnp.dot(x_ref[...], w_ref[...], preferred_element_type=jnp.float32)
        + b_ref[...]
    ).astype(o_ref.dtype)


# ----------------------------------------------------------------------------
# wrapper
# ----------------------------------------------------------------------------
def dense_forward(x, w, b, *, tile_b=128):
    """x: (..., in_dim); w: (in_dim, out_dim); b: (out_dim,) -> (..., out_dim)."""
    in_dim = x.shape[-1]
    out_dim = w.shape[1]
    lead_shape = x.shape[:-1]

    x2 = x.reshape(-1, in_dim)
    batch = x2.shape[0]

    # Row tile: multiple of 8 sublanes, no larger than the (padded) batch.
    tb = min(tile_b, ((batch + 7) // 8) * 8)
    padded = pl.cdiv(batch, tb) * tb
    if padded != batch:
        x2 = jnp.pad(x2, ((0, padded - batch), (0, 0)))

    out = pl.pallas_call(
        dense_kernel,
        out_shape=jax.ShapeDtypeStruct((padded, out_dim), x.dtype),
        grid=(padded // tb,),
        in_specs=[
            pl.BlockSpec((tb, in_dim), lambda i: (i, 0)),        # row tile of x
            pl.BlockSpec((in_dim, out_dim), lambda i: (0, 0)),   # resident weight
            pl.BlockSpec((1, out_dim), lambda i: (0, 0)),        # resident bias
        ],
        out_specs=pl.BlockSpec((tb, out_dim), lambda i: (i, 0)),
        compiler_params=pltpu.CompilerParams(
            dimension_semantics=("parallel",)),
    )(x2, w, b[None, :])

    out = out[:batch]
    return out.reshape(*lead_shape, out_dim)


def reference_forward(x, w, b):
    return x @ w + b


# ----------------------------------------------------------------------------
# demo / self-test
# ----------------------------------------------------------------------------
if __name__ == "__main__":
    key = jax.random.PRNGKey(0)
    k_x, k_w, k_b = jax.random.split(key, 3)

    # Small shapes consistent with the module: Dense(32, 256) — the 256-dim
    # output later reshapes to a 16x16 feature map. Batch of 300 rows
    # (non-divisible by the 128-row tile) exercises the padding path and
    # yields >= 2 parallel grid tiles.
    BATCH, IN_DIM, OUT_DIM = 300, 32, 256

    x = jax.random.normal(k_x, (BATCH, IN_DIM), jnp.float32)
    w = jax.random.normal(k_w, (IN_DIM, OUT_DIM), jnp.float32) * 0.05
    b = jax.random.normal(k_b, (OUT_DIM,), jnp.float32) * 0.05

    out = dense_forward(x, w, b)
    out = jax.block_until_ready(out)

    ref = reference_forward(x, w, b)
    assert out.shape == (BATCH, OUT_DIM), out.shape
    assert jnp.allclose(out, ref, rtol=2e-3, atol=2e-3), "mismatch vs reference"

    print("KERNEL_OK")
</pallas_src>

<mosaic_0001>
module attributes {stable_mosaic.version = 11 : i64} {
  func.func @dense_kernel(%arg0: i32, %arg1: memref<128x32xf32, #tpu.memory_space<vmem>>, %arg2: memref<32x256xf32, #tpu.memory_space<vmem>>, %arg3: memref<1x256xf32, #tpu.memory_space<vmem>>, %arg4: memref<128x256xf32, #tpu.memory_space<vmem>>) attributes {dimension_semantics = [#tpu.dimension_semantics<parallel>], iteration_bounds = array<i64: 3>, scalar_prefetch = 0 : i64, scratch_operands = 0 : i64, tpu.core_type = #tpu.core_type<tc>, window_params = [{transform_indices = @transform_0, window_bounds = array<i64: 128, 32>}, {pipeline_mode = #tpu.pipeline_mode<synchronous>, transform_indices = @transform_1, window_bounds = array<i64: 32, 256>}, {pipeline_mode = #tpu.pipeline_mode<synchronous>, transform_indices = @transform_2, window_bounds = array<i64: 1, 256>}, {transform_indices = @transform_3, window_bounds = array<i64: 128, 256>}]} {
    %c0 = arith.constant 0 : index
    %c0_0 = arith.constant 0 : index
    %0 = vector.load %arg1[%c0, %c0_0] : memref<128x32xf32, #tpu.memory_space<vmem>>, vector<128x32xf32>
    %c0_1 = arith.constant 0 : index
    %c0_2 = arith.constant 0 : index
    %1 = vector.load %arg2[%c0_1, %c0_2] : memref<32x256xf32, #tpu.memory_space<vmem>>, vector<32x256xf32>
    %cst = arith.constant dense<0.000000e+00> : vector<128x256xf32>
    %2 = tpu.matmul %0, %1, %cst {dimension_numbers = #tpu.dot_dimension_numbers<[1], [0], [0], [1], [0, 0, 1, 1], [], []>} : vector<128x32xf32>, vector<32x256xf32>, vector<128x256xf32> -> vector<128x256xf32>
    %c0_3 = arith.constant 0 : index
    %c0_4 = arith.constant 0 : index
    %3 = vector.load %arg3[%c0_3, %c0_4] : memref<1x256xf32, #tpu.memory_space<vmem>>, vector<1x256xf32>
    %4 = vector.broadcast %3 : vector<1x256xf32> to vector<128x256xf32>
    %5 = arith.addf %2, %4 : vector<128x256xf32>
    %c0_5 = arith.constant 0 : index
    %c0_6 = arith.constant 0 : index
    %6 = vector.load %arg4[%c0_5, %c0_6] : memref<128x256xf32, #tpu.memory_space<vmem>>, vector<128x256xf32>
    tpu.vector_store %arg4[%c0_5, %c0_6], %5 {strides = array<i32>} : memref<128x256xf32, #tpu.memory_space<vmem>>, vector<128x256xf32>,
    return
  }
  func.func @transform_0(%arg0: i32) -> (i32, i32) {
    %c0_i32 = arith.constant 0 : i32
    %c0_i32_0 = arith.constant 0 : i32
    return %arg0, %c0_i32 : i32, i32
  }
  func.func @transform_1(%arg0: i32) -> (i32, i32) {
    %c0_i32 = arith.constant 0 : i32
    %c0_i32_0 = arith.constant 0 : i32
    %c0_i32_1 = arith.constant 0 : i32
    return %c0_i32, %c0_i32_0 : i32, i32
  }
  func.func @transform_2(%arg0: i32) -> (i32, i32) {
    %c0_i32 = arith.constant 0 : i32
    %c0_i32_0 = arith.constant 0 : i32
    %c0_i32_1 = arith.constant 0 : i32
    return %c0_i32, %c0_i32_0 : i32, i32
  }
  func.func @transform_3(%arg0: i32) -> (i32, i32) {
    %c0_i32 = arith.constant 0 : i32
    %c0_i32_0 = arith.constant 0 : i32
    return %arg0, %c0_i32 : i32, i32
  }
}

</mosaic_0001>

<bundles_post_ra>
// kernel: tpu_custom_call.1
= control target key start
LH: loop header
LB: loop body
LE: loop exit
PB: predicated region body
PF: predicated region fallthrough
CT: control target
= control target key end

     0   :  { %8 = vsyncpa [#allocation3], 0  ;;  %s931_s0 = inlined_call_operand.vmem [shape: f32[384,32], index: 0, kind: input, shape index: {}]   ;;  %s932_s1 = inlined_call_operand.vmem [shape: f32[32,256], index: 1, kind: input, shape index: {}]   ;;  %s933_s2 = inlined_call_operand.vmem [shape: f32[1,256], index: 2, kind: input, shape index: {}]   ;;  %s934_s3 = inlined_call_operand.hbm [shape: f32[384,256], index: 3, kind: output, shape index: {}]  }
   0x1   :  { %10 = vsyncpa [#allocation3 + $0x1], 0  ;;  %s694_s12 = smov 0   ;;  %s696_s13 = smov 0  }
   0x2   :  { %s698_s14 = smov 0   ;;  %s700_s15 = smov 0  }
   0x3 LB: > { %s715_s16 = sadd.s32 4294967295, %s668_s15   ;;  %s527_s17 = sadd.s32 4294967294, %s668_s15   ;;  %s668_s15 = sphi %s700_s15, %s940_s15   ;;  %s664_s14 = sphi %s698_s14, %s939_s14   ;;  %s660_s13 = sphi %s696_s13, %s938_s13   ;;  %s656_s12 = sphi %s694_s12, %s937_s12  }
   0x4   : > { %s719_s18 = sadd.s32 1, %s668_s15   ;;  %s91_s19 = sadd.s32 1, %s664_s14 }
   0x5   : > { %s88_s20 = ssub.s32 %s668_s15, %s719_s18  ;;  %p101_p0 = scmp.ne.s32.totalorder %s664_s14, %s660_s13 }
   0x6   : > { %p89_p1 = scmp.eq.s32.totalorder %s88_s20, 0  ;;  %p102_p2 = scmp.eq.s32.totalorder %s715_s16, 2 }
   0x7   : > { %p107_p3 = scmp.ne.s32.totalorder %s660_s13, %s656_s12  ;;  %p108_p4 = scmp.eq.s32.totalorder %s527_s17, 2 }
   0x8   : > { %s730_s21 = scalar_select %p89_p1, %s664_s14, %s91_s19  }
   0x9   : > { %p732_p5 = por %p102_p2, %p101_p0  ;;  %p736_p6 = por %p108_p4, %p107_p3 }
   0xa   : > { %p530_p7 = scmp.ge.s32.totalorder %s668_s15, 1  ;;  %p141_p8 = scmp.lt.s32.totalorder %s668_s15, 4 }
   0xc   : > { %p142_p9 = pnand %p530_p7, %p141_p8 }
   0xd   : > { %s532_s30 = sshll.u32 (!%p142_p9), %s715_s16, 4  ;;  %s162_s27 = sand.u32 (!%p142_p9), 1, %s660_s13  }
   0xe   : > { %145 = sbr.rel (%p142_p9) target bundleno = 268 (0x10c), region = 32  ;;  %p166_p10 = scmp.lt.s32.totalorder (!%p142_p9), %s532_s30, 47 }
   0xf   : > { %s557_s5 = sshll.u32 (!%p142_p9), %s715_s16, 12  ;;  %s891_s16 = scalar_lea.sflag (!%p142_p9), [#allocation3], %s162_s27 }
  0x10   : > { %s879_s9 = scalar_lea.hbm (!%p142_p9), %s934_s3, %s557_s5  ;;  %s671_s11 = smov (!%p142_p9), [#allocation2]  }
  0x11   : > { %s612_s17 = sshll.u32 (!%p142_p9), %s671_s11, 4  ;;  %s613_s17 = int_to_ptr.vmem [resolvable:$false] %s612_s17 }
  0x12   : > { %s614_s19 = scalar_lea.vmem (!%p142_p9), %s613_s17, 8192 }
  0x13   : > { %v195_v0 = vld [vmem:[%s932_s1 + $0x38] sm:$0xff]  ;;  %v194_v1 = vld [vmem:[%s932_s1 + $0x30] sm:$0xff]  ;;  %v193_v2 = vld [vmem:[%s932_s1 + $0x28] sm:$0xff]  ;;  %s942_s30 = smov (!%p166_p10, %s532_s30), 47  ;;  %vm208_vm0 = vcmask 261120   ;;  %v670_v10 = vmov 0.0   ;;  %v198_v25 = vlaneseq }
  0x14   : > { %281 = vmatprep.subr.mxu0 %v195_v0  ;;  %558 = vmatprep.subr.mxu1 %v195_v0  ;;  %v192_v3 = vld [vmem:[%s932_s1 + $0x20] sm:$0xff]  ;;  %v191_v4 = vld [vmem:[%s932_s1 + $0x18] sm:$0xff]  ;;  %v190_v5 = vld [vmem:[%s932_s1 + $0x10] sm:$0xff]  ;;  %s533_s20 = sshll.u32 %s942_s30, 3  ;;  %s531_s30 = sshll.u32 %s162_s27, 8 }
  0x15   : > { %282 = vmatpush1.msra.mxu0 %v194_v1  ;;  %562 = vmatpush1.msra.mxu1 %v194_v1  ;;  %v189_v6 = vld [vmem:[%s932_s1 + $0x8] sm:$0xff]  ;;  %v188_v7 = vld [vmem:[%s932_s1] sm:$0xff]  ;;  %s770_s26 = scalar_lea.vmem %s931_s0, %s533_s20  ;;  %v199_v26 = vshrl.u32 %v198_v25, 7  ;;  %s816_s4 = scalar_lea.vmem [#allocation2], %s531_s30 }
  0x16   : > { %283 = vmatprep.subr.mxu0 %v193_v2  ;;  %559 = vmatprep.subr.mxu1 %v193_v2  ;;  %v172_v8 = vld [vmem:[%s770_s26] sm:$0xff]  ;;  %v173_v11 = vld [vmem:[%s770_s26 + $0x8] sm:$0xff]  ;;  %v174_v13 = vld [vmem:[%s770_s26 + $0x10] sm:$0xff]  ;;  %s465_s6 = sshll.u32 %s816_s4, 4  ;;  %s881_s6 = int_to_ptr.vmem [resolvable:$true] %s465_s6 }
  0x17   : > { %284 = vmatpush1.msra.mxu0 %v192_v3  ;;  %563 = vmatpush1.msra.mxu1 %v192_v3  ;;  %v180_v9 = vld [vmem:[%s770_s26 + $0x40] sm:$0xff]  ;;  %v181_v12 = vld [vmem:[%s770_s26 + $0x48] sm:$0xff]  ;;  %v182_v14 = vld [vmem:[%s770_s26 + $0x50] sm:$0xff]  ;;  %v200_v27 = vsub.s32 0, %v199_v26  ;;  %v204_v29 = vsub.s32 1, %v199_v26  ;;  %s608_s10 = scalar_lea.vmem %s881_s6, 4096  ;;  %p615_p0 = scmp.lt.s32.totalorder %s881_s6, %s613_s17 }
  0x18   : > { %285 = vmatprep.subr.mxu0 %v191_v4  ;;  %560 = vmatprep.subr.mxu1 %v191_v4  ;;  %v175_v15 = vld [vmem:[%s770_s26 + $0x18] sm:$0xff]  ;;  %v176_v17 = vld [vmem:[%s770_s26 + $0x20] sm:$0xff]  ;;  %v177_v19 = vld [vmem:[%s770_s26 + $0x28] sm:$0xff]  ;;  %p609_p11 = scmp.ne.s32.totalorder %s881_s6, %s608_s10  ;;  %p616_p1 = scmp.lt.s32.totalorder %s614_s19, %s608_s10 }
  0x19   : > { %286 = vmatpush1.msra.mxu0 %v190_v5  ;;  %564 = vmatpush1.msra.mxu1 %v190_v5  ;;  %v183_v16 = vld [vmem:[%s770_s26 + $0x58] sm:$0xff]  ;;  %v184_v18 = vld [vmem:[%s770_s26 + $0x60] sm:$0xff]  ;;  %v185_v20 = vld [vmem:[%s770_s26 + $0x68] sm:$0xff] }
  0x1a   : > { %287 = vmatprep.subr.mxu0 %v189_v6  ;;  %561 = vmatprep.subr.mxu1 %v189_v6  ;;  %v178_v21 = vld [vmem:[%s770_s26 + $0x30] sm:$0xff]  ;;  %v179_v23 = vld [vmem:[%s770_s26 + $0x38] sm:$0xff]  ;;  %v196_v28 = vld [vmem:[%s933_s2] sm:$0x3]  ;;  %p610_p12 = pnand %p609_p11, %p732_p5  ;;  %p617_p2 = por %p616_p1, %p615_p0 }
  0x1b   : > { %288 = vmatpush1.msra.mxu0 %v188_v7  ;;  %565 = vmatpush1.msra.mxu1 %v188_v7  ;;  %v186_v22 = vld [vmem:[%s770_s26 + $0x70] sm:$0xff]  ;;  %v187_v24 = vld [vmem:[%s770_s26 + $0x78] sm:$0xff]  ;;  %v810_v30 = vrot.slane %v196_v28, %v200_v27  ;;  %v812_v31 = vrot.slane %v196_v28, %v204_v29 }
  0x1c   : > { %321 = vmatprep.mubr.f32.mxu0 %v670_v10  ;;  %369 = vmatprep.mubr.f32.mxu1 %v670_v10  ;;  %p611_p13 = pneg %p610_p12 }
  0x1d   : > { %534 = vmatmul.mubr.msk.f32.vlgmr.msra.gmra.mxu0 %vm208_vm0, %v172_v8  ;;  %542 = vmatmul.mubr.msk.f32.vlgmr.msra.gmra.mxu1 %vm208_vm0, %v180_v9 }
  0x1e   : > { %327 = vmatprep.mubr.f32.mxu0 %v670_v10  ;;  %375 = vmatprep.mubr.f32.mxu1 %v670_v10  ;;  %p618_p3 = pnand %p617_p2, %p611_p13 }
  0x21   : > { %535 = vmatmul.mubr.msk.f32.gmra.mxu0 %vm208_vm0, %v173_v11  ;;  %543 = vmatmul.mubr.msk.f32.gmra.mxu1 %vm208_vm0, %v181_v12 }
  0x22   : > { %333 = vmatprep.mubr.f32.mxu0 %v670_v10  ;;  %381 = vmatprep.mubr.f32.mxu1 %v670_v10 }
  0x25   : > { %536 = vmatmul.mubr.msk.f32.gmra.mxu0 %vm208_vm0, %v174_v13  ;;  %544 = vmatmul.mubr.msk.f32.gmra.mxu1 %vm208_vm0, %v182_v14 }
  0x26   : > { %339 = vmatprep.mubr.f32.mxu0 %v670_v10  ;;  %387 = vmatprep.mubr.f32.mxu1 %v670_v10 }
  0x29   : > { %537 = vmatmul.mubr.msk.f32.gmra.mxu0 %vm208_vm0, %v175_v15  ;;  %545 = vmatmul.mubr.msk.f32.gmra.mxu1 %vm208_vm0, %v183_v16 }
  0x2a   : > { %345 = vmatprep.mubr.f32.mxu0 %v670_v10  ;;  %393 = vmatprep.mubr.f32.mxu1 %v670_v10 }
  0x2d   : > { %538 = vmatmul.mubr.msk.f32.gmra.mxu0 %vm208_vm0, %v176_v17  ;;  %546 = vmatmul.mubr.msk.f32.gmra.mxu1 %vm208_vm0, %v184_v18 }
  0x2e   : > { %351 = vmatprep.mubr.f32.mxu0 %v670_v10  ;;  %399 = vmatprep.mubr.f32.mxu1 %v670_v10 }
  0x31   : > { %539 = vmatmul.mubr.msk.f32.gmra.mxu0 %vm208_vm0, %v177_v19  ;;  %547 = vmatmul.mubr.msk.f32.gmra.mxu1 %vm208_vm0, %v185_v20 }
  0x32   : > { %357 = vmatprep.mubr.f32.mxu0 %v670_v10  ;;  %405 = vmatprep.mubr.f32.mxu1 %v670_v10 }
  0x35   : > { %540 = vmatmul.mubr.msk.f32.gmra.mxu0 %vm208_vm0, %v178_v21  ;;  %548 = vmatmul.mubr.msk.f32.gmra.mxu1 %vm208_vm0, %v186_v22 }
  0x36   : > { %363 = vmatprep.mubr.f32.mxu0 %v670_v10  ;;  %411 = vmatprep.mubr.f32.mxu1 %v670_v10 }
  0x39   : > { %541 = vmatmul.mubr.msk.f32.gmra.mxu0 %vm208_vm0, %v179_v23  ;;  %549 = vmatmul.mubr.msk.f32.gmra.mxu1 %vm208_vm0, %v187_v24 }
  0xdd   : > { %v323_v32 = vpop.f32.mrf.mxu0  ;;  %v371_v33 = vpop.f32.mrf.mxu1 }
  0xde   : > { %v324_v34 = vadd.f32 %v323_v32, %v810_v30  ;;  %v372_v35 = vadd.f32 %v371_v33, %v810_v30 }
  0xdf   : > { %v325_v36 = vpop.f32.mrf.mxu0  ;;  %v373_v37 = vpop.f32.mrf.mxu1 }
  0xe0   : > { %418 = vst [vmem:[%s816_s4] sm:$0xff] %v324_v34  ;;  %434 = vst [vmem:[%s816_s4 + $0x80] sm:$0xff] %v372_v35  ;;  %v326_v38 = vadd.f32 %v325_v36, %v812_v31  ;;  %v374_v39 = vadd.f32 %v373_v37, %v812_v31 }
  0xe1   : > { %v329_v40 = vpop.f32.mrf.mxu0  ;;  %v377_v41 = vpop.f32.mrf.mxu1 }
  0xe2   : > { %419 = vst [vmem:[%s816_s4 + $0x8] sm:$0xff] %v326_v38  ;;  %435 = vst [vmem:[%s816_s4 + $0x88] sm:$0xff] %v374_v39  ;;  %v330_v42 = vadd.f32 %v329_v40, %v810_v30  ;;  %v378_v43 = vadd.f32 %v377_v41, %v810_v30 }
  0xe3   : > { %v331_v44 = vpop.f32.mrf.mxu0  ;;  %v379_v45 = vpop.f32.mrf.mxu1 }
  0xe4   : > { %420 = vst [vmem:[%s816_s4 + $0x10] sm:$0xff] %v330_v42  ;;  %436 = vst [vmem:[%s816_s4 + $0x90] sm:$0xff] %v378_v43  ;;  %v332_v46 = vadd.f32 %v331_v44, %v812_v31  ;;  %v380_v47 = vadd.f32 %v379_v45, %v812_v31 }
  0xe5   : > { %v335_v48 = vpop.f32.mrf.mxu0  ;;  %v383_v49 = vpop.f32.mrf.mxu1 }
  0xe6   : > { %421 = vst [vmem:[%s816_s4 + $0x18] sm:$0xff] %v332_v46  ;;  %437 = vst [vmem:[%s816_s4 + $0x98] sm:$0xff] %v380_v47  ;;  %v336_v50 = vadd.f32 %v335_v48, %v810_v30  ;;  %v384_v51 = vadd.f32 %v383_v49, %v810_v30 }
  0xe7   : > { %v337_v52 = vpop.f32.mrf.mxu0  ;;  %v385_v53 = vpop.f32.mrf.mxu1 }
  0xe8   : > { %422 = vst [vmem:[%s816_s4 + $0x20] sm:$0xff] %v336_v50  ;;  %438 = vst [vmem:[%s816_s4 + $0xa0] sm:$0xff] %v384_v51  ;;  %v338_v54 = vadd.f32 %v337_v52, %v812_v31  ;;  %v386_v55 = vadd.f32 %v385_v53, %v812_v31 }
  0xe9   : > { %v341_v56 = vpop.f32.mrf.mxu0  ;;  %v389_v57 = vpop.f32.mrf.mxu1 }
  0xea   : > { %423 = vst [vmem:[%s816_s4 + $0x28] sm:$0xff] %v338_v54  ;;  %439 = vst [vmem:[%s816_s4 + $0xa8] sm:$0xff] %v386_v55  ;;  %v342_v58 = vadd.f32 %v341_v56, %v810_v30  ;;  %v390_v59 = vadd.f32 %v389_v57, %v810_v30 }
  0xeb   : > { %v343_v60 = vpop.f32.mrf.mxu0  ;;  %v391_v61 = vpop.f32.mrf.mxu1 }
  0xec   : > { %424 = vst [vmem:[%s816_s4 + $0x30] sm:$0xff] %v342_v58  ;;  %440 = vst [vmem:[%s816_s4 + $0xb0] sm:$0xff] %v390_v59  ;;  %v344_v62 = vadd.f32 %v343_v60, %v812_v31  ;;  %v392_v63 = vadd.f32 %v391_v61, %v812_v31 }
  0xed   : > { %v347_v0 = vpop.f32.mrf.mxu0  ;;  %v395_v1 = vpop.f32.mrf.mxu1 }
  0xee   : > { %425 = vst [vmem:[%s816_s4 + $0x38] sm:$0xff] %v344_v62  ;;  %441 = vst [vmem:[%s816_s4 + $0xb8] sm:$0xff] %v392_v63  ;;  %v348_v2 = vadd.f32 %v347_v0, %v810_v30  ;;  %v396_v3 = vadd.f32 %v395_v1, %v810_v30 }
  0xef   : > { %v349_v4 = vpop.f32.mrf.mxu0  ;;  %v397_v5 = vpop.f32.mrf.mxu1 }
  0xf0   : > { %426 = vst [vmem:[%s816_s4 + $0x40] sm:$0xff] %v348_v2  ;;  %442 = vst [vmem:[%s816_s4 + $0xc0] sm:$0xff] %v396_v3  ;;  %v350_v6 = vadd.f32 %v349_v4, %v812_v31  ;;  %v398_v7 = vadd.f32 %v397_v5, %v812_v31 }
  0xf1   : > { %v353_v8 = vpop.f32.mrf.mxu0  ;;  %v401_v9 = vpop.f32.mrf.mxu1 }
  0xf2   : > { %427 = vst [vmem:[%s816_s4 + $0x48] sm:$0xff] %v350_v6  ;;  %443 = vst [vmem:[%s816_s4 + $0xc8] sm:$0xff] %v398_v7  ;;  %v354_v10 = vadd.f32 %v353_v8, %v810_v30  ;;  %v402_v11 = vadd.f32 %v401_v9, %v810_v30 }
  0xf3   : > { %v355_v12 = vpop.f32.mrf.mxu0  ;;  %v403_v13 = vpop.f32.mrf.mxu1 }
  0xf4   : > { %428 = vst [vmem:[%s816_s4 + $0x50] sm:$0xff] %v354_v10  ;;  %444 = vst [vmem:[%s816_s4 + $0xd0] sm:$0xff] %v402_v11  ;;  %v356_v14 = vadd.f32 %v355_v12, %v812_v31  ;;  %v404_v15 = vadd.f32 %v403_v13, %v812_v31 }
  0xf5   : > { %v359_v16 = vpop.f32.mrf.mxu0  ;;  %v407_v17 = vpop.f32.mrf.mxu1 }
  0xf6   : > { %429 = vst [vmem:[%s816_s4 + $0x58] sm:$0xff] %v356_v14  ;;  %445 = vst [vmem:[%s816_s4 + $0xd8] sm:$0xff] %v404_v15  ;;  %v360_v18 = vadd.f32 %v359_v16, %v810_v30  ;;  %v408_v19 = vadd.f32 %v407_v17, %v810_v30 }
  0xf7   : > { %v361_v20 = vpop.f32.mrf.mxu0  ;;  %v409_v21 = vpop.f32.mrf.mxu1 }
  0xf8   : > { %430 = vst [vmem:[%s816_s4 + $0x60] sm:$0xff] %v360_v18  ;;  %446 = vst [vmem:[%s816_s4 + $0xe0] sm:$0xff] %v408_v19  ;;  %v362_v22 = vadd.f32 %v361_v20, %v812_v31  ;;  %v410_v23 = vadd.f32 %v409_v21, %v812_v31 }
  0xf9   : > { %v365_v24 = vpop.f32.mrf.mxu0  ;;  %v413_v25 = vpop.f32.mrf.mxu1 }
  0xfa   : > { %431 = vst [vmem:[%s816_s4 + $0x68] sm:$0xff] %v362_v22  ;;  %447 = vst [vmem:[%s816_s4 + $0xe8] sm:$0xff] %v410_v23  ;;  %v366_v26 = vadd.f32 %v365_v24, %v810_v30  ;;  %v414_v27 = vadd.f32 %v413_v25, %v810_v30 }
  0xfb   : > { %v367_v28 = vpop.f32.mrf.mxu0  ;;  %v415_v29 = vpop.f32.mrf.mxu1 }
  0xfc   : > { %432 = vst [vmem:[%s816_s4 + $0x70] sm:$0xff] %v366_v26  ;;  %448 = vst [vmem:[%s816_s4 + $0xf0] sm:$0xff] %v414_v27  ;;  %v368_v32 = vadd.f32 %v367_v28, %v812_v31  ;;  %v416_v33 = vadd.f32 %v415_v29, %v812_v31 }
  0xfe   : > { %433 = vst [vmem:[%s816_s4 + $0x78] sm:$0xff] %v368_v32  ;;  %449 = vst [vmem:[%s816_s4 + $0xf8] sm:$0xff] %v416_v33 }
  0xff   : > { %621 = shalt.err (!%p618_p3)
}
 0x100   : > { %s622_s20 = scalar_lea.hbm %s879_s9, 4096  ;;  %s626_s26 = scalar_lea.hbm %s934_s3, 12288 }
 0x101   : > { %p623_p4 = scmp.ne.s32.totalorder %s879_s9, %s622_s20  ;;  %p627_p9 = scmp.lt.s32.totalorder %s879_s9, %s934_s3 }
 0x102   : > { %p628_p10 = scmp.lt.s32.totalorder %s626_s26, %s622_s20 }
 0x103   : > { %p624_p7 = pnand %p623_p4, %p732_p5 }
 0x104   : > { %p629_p11 = por %p628_p10, %p627_p9 }
 0x105   : > { %p625_p8 = pneg %p624_p7 }
 0x107   : > { %p630_p12 = pnand %p629_p11, %p625_p8 }
 0x109   : > { %633 = shalt.err (!%p630_p12)
}
 0x10a   : > { %s672_s29 = smov 256   ;;  %s673_s30 = smov 16  }
 0x10b   : > { %566 = dma.vmem_to_hbm [thread:$0]  (%p732_p5), %s881_s6, 4096, %s879_s9, %s891_s16, %s672_s29, %s672_s29, %s673_s30  }
 0x10c PF: > { %p572_p13 = scmp.ge.s32.totalorder %s668_s15, 2  ;;  %s480_s4 = sand.u32 1, %s656_s12  }
 0x10d   : > { %s481_s5 = scalar_lea.sflag [#allocation3], %s480_s4 }
 0x10e   : > { %p569_p0 = pnand %p572_p13, %p736_p6 }
 0x110   : > { %p570_p1 = pneg %p569_p0 }
 0x112   : > { %651 = dma.done.wait (%p570_p1), %s481_s5, 4096  }
 0x113   : > { %653 = vsyncadd (%p570_p1), %s481_s5, 4294963200  ;;  %p13_p2 = scmp.ge.s32.totalorder %s719_s18, 5   ;;  %s937_s12 = smov %s660_s13 }
 0x114   : > { %s938_s13 = smov %s664_s14  ;;  %s939_s14 = smov %s730_s21 }
 0x115   : > { %s940_s15 = smov %s719_s18  ;;  %15 = sbr.rel (!%p13_p2) target bundleno = 3 (0x3), region = 67 }
 0x11a   :  { %486 = vsyncpa [#allocation3], 1 }
 0x11b   :  { %488 = vsyncpa [#allocation3 + $0x1], 1 }

</bundles_post_ra>
